<compile_context>
chip_gen: v6e
topology: v6e:2x2x1
jax: 0.10.0
libtpu: 0.0.40
codegen_flags: <defaults>
</compile_context>

<pallas_src>
import math

import jax
import jax.numpy as jnp
from jax.experimental import pallas as pl
from jax.experimental.pallas import tpu as pltpu


def _round_up(x, m):
    return (x + m - 1) // m * m


def _vis_proj_kernel(x_ref, w_ref, b_ref, o_ref):
    w = w_ref[...]
    # Cast only the activation in-kernel (weight already lives in its compute dtype).
    x = x_ref[...].astype(w.dtype)
    y = jnp.dot(x, w, preferred_element_type=jnp.float32)   # MXU, f32 accumulate
    o_ref[...] = (y + b_ref[...]).astype(o_ref.dtype)       # bias add on VPU, f32


def prepare_visual_projection_params(weight, bias, *, use_bf16=False):
    """One-time parameter layout (do this at module init, NOT per forward call).

    weight: [visual_dim, dim]  (torch Conv1d weight [dim, visual_dim, 1], squeezed+transposed)
    bias:   [dim]
    Returns (w_padded [visual_dim, N_pad], b_padded [1, N_pad] f32) with N_pad a multiple
    of 128 (lane-dense stores). If use_bf16, the weight is stored bf16 in HBM.
    """
    Vd, D = weight.shape
    N_pad = _round_up(D, 128)
    w_dtype = jnp.bfloat16 if use_bf16 else jnp.float32
    wp = jnp.pad(weight.astype(jnp.float32), ((0, 0), (0, N_pad - D))).astype(w_dtype)
    bp = jnp.pad(bias.astype(jnp.float32).reshape(1, D), ((0, 0), (0, N_pad - D)))
    return wp, bp


def visual_projection(visual_features, w_padded, b_padded, *, drop_rate=0.0,
                      out_dtype=jnp.float32, max_block_rows=512,
                      vmem_budget_bytes=48 << 20):
    """VisualProjection forward (Dropout = identity in eval mode / p=0).

    visual_features: [B, T, visual_dim]
    w_padded:        [visual_dim, N_pad]   from prepare_visual_projection_params
    b_padded:        [1, N_pad] float32    from prepare_visual_projection_params
    returns:         [B, T, dim_out] with dim_out = original dim (columns >= dim are pad)
    """
    if drop_rate != 0.0:
        # TODO(synk): training-mode dropout (pltpu.prng_seed + stateful_bernoulli) if needed.
        raise NotImplementedError("drop_rate > 0 (training-mode dropout) not implemented")

    B, T, Vd = visual_features.shape
    K, N_pad = w_padded.shape
    assert K == Vd, (K, Vd)
    M = B * T
    x2 = visual_features.reshape(M, Vd)

    use_bf16 = w_padded.dtype == jnp.bfloat16
    w_isize = jnp.dtype(w_padded.dtype).itemsize
    x_isize = jnp.dtype(x2.dtype).itemsize
    o_isize = jnp.dtype(out_dtype).itemsize

    # --- tile selection -----------------------------------------------------
    # N tile: keep the whole weight resident when small; otherwise stream 512-wide
    # column tiles (multiple of 128 for v5e MXU passes and of 256 for v6e/v7x).
    tn = N_pad if N_pad <= 2048 else 512
    grid_n = pl.cdiv(N_pad, tn)

    # Row tile: multiple of 8 (16 for bf16 MXU sublane packing), capped by
    # max_block_rows, shrunk until the VMEM estimate fits the budget.
    row_q = 16 if use_bf16 else 8
    tm = min(_round_up(max_block_rows, row_q), _round_up(M, row_q))

    def vmem_bytes(tm_):
        w_bufs = 1 if grid_n == 1 else 2          # single-buffer grid-invariant weight
        return (w_bufs * K * tn * w_isize          # weight tile(s)
                + w_bufs * tn * 4                  # bias tile(s), f32
                + 2 * tm_ * K * x_isize            # double-buffered x tiles
                + 2 * tm_ * tn * o_isize)          # double-buffered out tiles

    while tm > row_q and vmem_bytes(tm) > vmem_budget_bytes:
        tm = max(row_q, (tm // 2) // row_q * row_q)

    grid_m = pl.cdiv(M, tm)
    vmem_limit = int(min(64 << 20, max(16 << 20, vmem_bytes(tm) * 1.25 + (1 << 20))))

    # --- block specs ----------------------------------------------------------
    # Weight/bias are grid-invariant when grid_n == 1: single pipeline buffer.
    wb_kwargs = dict(pipeline_mode=pl.Buffered(1)) if grid_n == 1 else {}

    x_spec = pl.BlockSpec((tm, K), lambda i, j: (i, 0))
    w_spec = pl.BlockSpec((K, tn), lambda i, j: (0, j), **wb_kwargs)
    b_spec = pl.BlockSpec((1, tn), lambda i, j: (0, j), **wb_kwargs)
    o_spec = pl.BlockSpec((tm, tn), lambda i, j: (i, j))

    out = pl.pallas_call(
        _vis_proj_kernel,
        out_shape=jax.ShapeDtypeStruct((M, N_pad), out_dtype),
        grid=(grid_m, grid_n),
        in_specs=[x_spec, w_spec, b_spec],
        out_specs=o_spec,
        compiler_params=pltpu.CompilerParams(
            dimension_semantics=("parallel", "parallel"),   # megacore-friendly on v7x
            vmem_limit_bytes=vmem_limit),
    )(x2, w_padded, b_padded)

    return out.reshape(B, T, N_pad)


if __name__ == "__main__":
    # Small shapes consistent with the module: batch=2, seq=16,
    # visual_dim=256 projected down to dim=128 (lane-dense output, no padding needed).
    B, T, VISUAL_DIM, DIM = 2, 16, 256, 128

    key = jax.random.PRNGKey(0)
    k_x, k_w, k_b = jax.random.split(key, 3)
    visual_features = jax.random.normal(k_x, (B, T, VISUAL_DIM), jnp.float32)
    # torch Conv1d(k=1) weight is [dim, visual_dim, 1]; we store it as [Vd, D].
    bound = 1.0 / math.sqrt(VISUAL_DIM)
    w = jax.random.uniform(k_w, (VISUAL_DIM, DIM), jnp.float32, -bound, bound)
    b = jax.random.uniform(k_b, (DIM,), jnp.float32, -bound, bound)

    # Plain-JAX reference of the same math (eval-mode Dropout is identity).
    ref = (visual_features.reshape(B * T, VISUAL_DIM) @ w + b).reshape(B, T, DIM)

    # f32 path: exact parity with the PyTorch module.
    wp, bp = prepare_visual_projection_params(w, b, use_bf16=False)   # one-time, at init
    out = jax.block_until_ready(visual_projection(visual_features, wp, bp))
    out = out[..., :DIM]
    assert out.shape == (B, T, DIM)
    assert jnp.allclose(out, ref, rtol=1e-5, atol=1e-5), float(jnp.max(jnp.abs(out - ref)))

    # bf16-weight fast path: halved weight DMA/VMEM, f32 MXU accumulate.
    wp16, bp16 = prepare_visual_projection_params(w, b, use_bf16=True)
    out16 = jax.block_until_ready(visual_projection(visual_features, wp16, bp16))[..., :DIM]
    assert out16.shape == (B, T, DIM)
    assert jnp.allclose(out16, ref, rtol=2e-2, atol=2e-2), float(jnp.max(jnp.abs(out16 - ref)))

    print("KERNEL_OK")
</pallas_src>

<mosaic_0001>
module attributes {stable_mosaic.version = 11 : i64} {
  func.func @_vis_proj_kernel(%arg0: i32, %arg1: i32, %arg2: memref<32x256xf32, #tpu.memory_space<vmem>>, %arg3: memref<256x128xf32, #tpu.memory_space<vmem>>, %arg4: memref<1x128xf32, #tpu.memory_space<vmem>>, %arg5: memref<32x128xf32, #tpu.memory_space<vmem>>) attributes {dimension_semantics = [#tpu.dimension_semantics<parallel>, #tpu.dimension_semantics<parallel>], iteration_bounds = array<i64: 1, 1>, scalar_prefetch = 0 : i64, scratch_operands = 0 : i64, tpu.core_type = #tpu.core_type<tc>, window_params = [{transform_indices = @transform_0, window_bounds = array<i64: 32, 256>}, {pipeline_mode = #tpu.pipeline_mode<synchronous>, transform_indices = @transform_1, window_bounds = array<i64: 256, 128>}, {pipeline_mode = #tpu.pipeline_mode<synchronous>, transform_indices = @transform_2, window_bounds = array<i64: 1, 128>}, {transform_indices = @transform_3, window_bounds = array<i64: 32, 128>}]} {
    %c0 = arith.constant 0 : index
    %c0_0 = arith.constant 0 : index
    %0 = vector.load %arg3[%c0, %c0_0] : memref<256x128xf32, #tpu.memory_space<vmem>>, vector<256x128xf32>
    %c0_1 = arith.constant 0 : index
    %c0_2 = arith.constant 0 : index
    %1 = vector.load %arg2[%c0_1, %c0_2] : memref<32x256xf32, #tpu.memory_space<vmem>>, vector<32x256xf32>
    %cst = arith.constant dense<0.000000e+00> : vector<32x128xf32>
    %2 = tpu.matmul %1, %0, %cst {dimension_numbers = #tpu.dot_dimension_numbers<[1], [0], [0], [1], [0, 0, 1, 1], [], []>} : vector<32x256xf32>, vector<256x128xf32>, vector<32x128xf32> -> vector<32x128xf32>
    %c0_3 = arith.constant 0 : index
    %c0_4 = arith.constant 0 : index
    %3 = vector.load %arg4[%c0_3, %c0_4] : memref<1x128xf32, #tpu.memory_space<vmem>>, vector<1x128xf32>
    %4 = vector.broadcast %3 : vector<1x128xf32> to vector<32x128xf32>
    %5 = arith.addf %2, %4 : vector<32x128xf32>
    %c0_5 = arith.constant 0 : index
    %c0_6 = arith.constant 0 : index
    %6 = vector.load %arg5[%c0_5, %c0_6] : memref<32x128xf32, #tpu.memory_space<vmem>>, vector<32x128xf32>
    tpu.vector_store %arg5[%c0_5, %c0_6], %5 {strides = array<i32>} : memref<32x128xf32, #tpu.memory_space<vmem>>, vector<32x128xf32>,
    return
  }
  func.func @transform_0(%arg0: i32, %arg1: i32) -> (i32, i32) {
    %c0_i32 = arith.constant 0 : i32
    %c0_i32_0 = arith.constant 0 : i32
    return %arg0, %c0_i32 : i32, i32
  }
  func.func @transform_1(%arg0: i32, %arg1: i32) -> (i32, i32) {
    %c0_i32 = arith.constant 0 : i32
    %c0_i32_0 = arith.constant 0 : i32
    return %c0_i32, %arg1 : i32, i32
  }
  func.func @transform_2(%arg0: i32, %arg1: i32) -> (i32, i32) {
    %c0_i32 = arith.constant 0 : i32
    %c0_i32_0 = arith.constant 0 : i32
    return %c0_i32, %arg1 : i32, i32
  }
  func.func @transform_3(%arg0: i32, %arg1: i32) -> (i32, i32) {
    %c0_i32 = arith.constant 0 : i32
    return %arg0, %arg1 : i32, i32
  }
}

</mosaic_0001>

<bundles_post_ra>
// kernel: tpu_custom_call.1
= control target key start
LH: loop header
LB: loop body
LE: loop exit
PB: predicated region body
PF: predicated region fallthrough
CT: control target
= control target key end

     0   :  { %8 = vsyncpa [#allocation3], 0  ;;  %s392_s0 = inlined_call_operand.hbm [shape: f32[32,256], index: 0, kind: input, shape index: {}]   ;;  %s393_s1 = inlined_call_operand.hbm [shape: f32[256,128], index: 1, kind: input, shape index: {}]   ;;  %s394_s2 = inlined_call_operand.vmem [shape: f32[1,128], index: 2, kind: input, shape index: {}]   ;;  %s395_s3 = inlined_call_operand.hbm [shape: f32[32,128], index: 3, kind: output, shape index: {}]  }
   0x1   :  { %9 = vsyncpa [#allocation6], 0 }
   0x2   :  { %10 = vsyncpa [#allocation4], 0  ;;  %s347_s12 = smov [#allocation2]  }
   0x3   :  { %s16_s13 = sshll.u32 %s347_s12, 4  ;;  %s17_s13 = int_to_ptr.vmem [resolvable:$true] %s16_s13 }
   0x4   :  { %s289_s14 = scalar_lea.vmem %s17_s13, 1024  ;;  %p294_p1 = scmp.lt.s32.totalorder %s17_s13, %s17_s13 }
   0x5   :  { %p290_p0 = scmp.ne.s32.totalorder %s17_s13, %s289_s14  ;;  %p295_p2 = scmp.lt.s32.totalorder %s289_s14, %s289_s14 }
   0x7   :  { %p296_p3 = por %p295_p2, %p294_p1 }
   0x9   :  { %p297_p4 = pnand %p296_p3, %p290_p0 }
   0xb   :  { %300 = shalt.err (!%p297_p4)
}
   0xc   :  { %s348_s15 = smov 256   ;;  %s349_s16 = smov 16  }
   0xd   :  { %22 = dma.hbm_to_vmem [thread:$0]  %s392_s0, 1024, %s17_s13, [#allocation3], %s348_s15, %s348_s15, %s349_s16  }
   0xe   :  { %s350_s19 = smov [#allocation5]  }
   0xf   :  { %s28_s20 = sshll.u32 %s350_s19, 4  ;;  %s29_s20 = int_to_ptr.vmem [resolvable:$true] %s28_s20 }
  0x10   :  { %s309_s21 = scalar_lea.vmem %s29_s20, 4096  ;;  %p314_p6 = scmp.lt.s32.totalorder %s29_s20, %s29_s20 }
  0x11   :  { %p310_p5 = scmp.ne.s32.totalorder %s29_s20, %s309_s21  ;;  %p315_p7 = scmp.lt.s32.totalorder %s309_s21, %s309_s21 }
  0x13   :  { %p316_p8 = por %p315_p7, %p314_p6 }
  0x15   :  { %p317_p9 = pnand %p316_p8, %p310_p5 }
  0x17   :  { %320 = shalt.err (!%p317_p9)
}
  0x18   :  { %s351_s22 = smov 128   ;;  %s352_s23 = smov 8  }
  0x19   :  { %34 = dma.hbm_to_vmem [thread:$0]  %s393_s1, 4096, %s29_s20, [#allocation6], %s351_s22, %s351_s22, %s352_s23  }
  0x1a   :  { %341 = dma.done.wait [#allocation3], 1024  }
  0x1b   :  { %342 = vsyncadd [#allocation3], 4294966272 }
  0x1c   :  { %343 = dma.done.wait [#allocation6], 4096  }
  0x1d   :  { %344 = vsyncadd [#allocation6], 4294963200  ;;  %v74_v0 = vld [vmem:[#allocation5 + $0xf8] sm:$0xff]  ;;  %v73_v2 = vld [vmem:[#allocation5 + $0xf0] sm:$0xff]  ;;  %s353_s26 = smov [#allocation7]  }
  0x1e   :  { %v58_v1 = vld [vmem:[#allocation5 + $0x78] sm:$0xff]  ;;  %198 = vmatprep.subr.mxu0 %v74_v0  ;;  %242 = vmatprep.subr.mxu1 %v74_v0  ;;  %v57_v3 = vld [vmem:[#allocation5 + $0x70] sm:$0xff]  ;;  %v72_v4 = vld [vmem:[#allocation5 + $0xe8] sm:$0xff]  ;;  %s184_s27 = sshll.u32 %s353_s26, 4  ;;  %s185_s27 = int_to_ptr.vmem [resolvable:$true] %s184_s27 }
  0x1f   :  { %199 = vmatpush3.msra.mxu0 %v58_v1  ;;  %258 = vmatpush3.msra.mxu1 %v58_v1  ;;  %v56_v5 = vld [vmem:[#allocation5 + $0x68] sm:$0xff]  ;;  %v71_v6 = vld [vmem:[#allocation5 + $0xe0] sm:$0xff]  ;;  %v70_v8 = vld [vmem:[#allocation5 + $0xd8] sm:$0xff]  ;;  %p326_p11 = scmp.lt.s32.totalorder %s185_s27, %s185_s27 }
  0x20   :  { %200 = vmatprep.subr.mxu0 %v73_v2  ;;  %243 = vmatprep.subr.mxu1 %v73_v2  ;;  %v55_v7 = vld [vmem:[#allocation5 + $0x60] sm:$0xff]  ;;  %v54_v9 = vld [vmem:[#allocation5 + $0x58] sm:$0xff]  ;;  %v69_v10 = vld [vmem:[#allocation5 + $0xd0] sm:$0xff] }
  0x21   :  { %201 = vmatpush3.msra.mxu0 %v57_v3  ;;  %259 = vmatpush3.msra.mxu1 %v57_v3  ;;  %v53_v11 = vld [vmem:[#allocation5 + $0x50] sm:$0xff]  ;;  %v68_v12 = vld [vmem:[#allocation5 + $0xc8] sm:$0xff]  ;;  %v67_v14 = vld [vmem:[#allocation5 + $0xc0] sm:$0xff] }
  0x22   :  { %202 = vmatprep.subr.mxu0 %v72_v4  ;;  %244 = vmatprep.subr.mxu1 %v72_v4  ;;  %v52_v13 = vld [vmem:[#allocation5 + $0x48] sm:$0xff]  ;;  %v51_v15 = vld [vmem:[#allocation5 + $0x40] sm:$0xff]  ;;  %v66_v16 = vld [vmem:[#allocation5 + $0xb8] sm:$0xff] }
  0x23   :  { %203 = vmatpush3.msra.mxu0 %v56_v5  ;;  %260 = vmatpush3.msra.mxu1 %v56_v5  ;;  %v50_v17 = vld [vmem:[#allocation5 + $0x38] sm:$0xff]  ;;  %v65_v18 = vld [vmem:[#allocation5 + $0xb0] sm:$0xff]  ;;  %v64_v20 = vld [vmem:[#allocation5 + $0xa8] sm:$0xff] }
  0x24   :  { %204 = vmatprep.subr.mxu0 %v71_v6  ;;  %245 = vmatprep.subr.mxu1 %v71_v6  ;;  %v49_v19 = vld [vmem:[#allocation5 + $0x30] sm:$0xff]  ;;  %v48_v21 = vld [vmem:[#allocation5 + $0x28] sm:$0xff]  ;;  %v63_v22 = vld [vmem:[#allocation5 + $0xa0] sm:$0xff] }
  0x25   :  { %205 = vmatpush3.msra.mxu0 %v55_v7  ;;  %261 = vmatpush3.msra.mxu1 %v55_v7  ;;  %v47_v23 = vld [vmem:[#allocation5 + $0x20] sm:$0xff]  ;;  %v62_v24 = vld [vmem:[#allocation5 + $0x98] sm:$0xff]  ;;  %v61_v26 = vld [vmem:[#allocation5 + $0x90] sm:$0xff] }
  0x26   :  { %206 = vmatprep.subr.mxu0 %v70_v8  ;;  %246 = vmatprep.subr.mxu1 %v70_v8  ;;  %v46_v25 = vld [vmem:[#allocation5 + $0x18] sm:$0xff]  ;;  %v45_v27 = vld [vmem:[#allocation5 + $0x10] sm:$0xff]  ;;  %v60_v28 = vld [vmem:[#allocation5 + $0x88] sm:$0xff] }
  0x27   :  { %207 = vmatpush3.msra.mxu0 %v54_v9  ;;  %262 = vmatpush3.msra.mxu1 %v54_v9  ;;  %v44_v29 = vld [vmem:[#allocation5 + $0x8] sm:$0xff]  ;;  %v59_v30 = vld [vmem:[#allocation5 + $0x80] sm:$0xff]  ;;  %v78_v36 = vld [vmem:[#allocation2 + $0x18] sm:$0xff] }
  0x28   :  { %208 = vmatprep.subr.mxu0 %v69_v10  ;;  %247 = vmatprep.subr.mxu1 %v69_v10  ;;  %v43_v31 = vld [vmem:[#allocation5] sm:$0xff]  ;;  %v76_v32 = vld [vmem:[#allocation2 + $0x8] sm:$0xff]  ;;  %v82_v37 = vld [vmem:[#allocation2 + $0x38] sm:$0xff] }
  0x29   :  { %209 = vmatpush3.msra.mxu0 %v53_v11  ;;  %263 = vmatpush3.msra.mxu1 %v53_v11  ;;  %v80_v33 = vld [vmem:[#allocation2 + $0x28] sm:$0xff]  ;;  %v75_v34 = vld [vmem:[#allocation2] sm:$0xff]  ;;  %v77_v38 = vld [vmem:[#allocation2 + $0x10] sm:$0xff] }
  0x2a   :  { %210 = vmatprep.subr.mxu0 %v68_v12  ;;  %248 = vmatprep.subr.mxu1 %v68_v12  ;;  %v79_v35 = vld [vmem:[#allocation2 + $0x20] sm:$0xff]  ;;  %v81_v39 = vld [vmem:[#allocation2 + $0x30] sm:$0xff] }
  0x2b   :  { %211 = vmatpush3.msra.mxu0 %v52_v13  ;;  %264 = vmatpush3.msra.mxu1 %v52_v13  ;;  %v197_v42 = vld [vmem:[%s394_s2] ss:$0 sm:$0xff]  ;;  %s321_s2 = scalar_lea.vmem %s185_s27, 512 }
  0x2c   :  { %212 = vmatprep.subr.mxu0 %v67_v14  ;;  %249 = vmatprep.subr.mxu1 %v67_v14  ;;  %p322_p10 = scmp.ne.s32.totalorder %s185_s27, %s321_s2  ;;  %p327_p12 = scmp.lt.s32.totalorder %s321_s2, %s321_s2 }
  0x2d   :  { %213 = vmatpush3.msra.mxu0 %v51_v15  ;;  %265 = vmatpush3.msra.mxu1 %v51_v15 }
  0x2e   :  { %214 = vmatprep.subr.mxu0 %v66_v16  ;;  %250 = vmatprep.subr.mxu1 %v66_v16  ;;  %p328_p13 = por %p327_p12, %p326_p11 }
  0x2f   :  { %215 = vmatpush3.msra.mxu0 %v50_v17  ;;  %266 = vmatpush3.msra.mxu1 %v50_v17 }
  0x30   :  { %216 = vmatprep.subr.mxu0 %v65_v18  ;;  %251 = vmatprep.subr.mxu1 %v65_v18  ;;  %p329_p0 = pnand %p328_p13, %p322_p10 }
  0x31   :  { %217 = vmatpush3.msra.mxu0 %v49_v19  ;;  %267 = vmatpush3.msra.mxu1 %v49_v19 }
  0x32   :  { %218 = vmatprep.subr.mxu0 %v64_v20  ;;  %252 = vmatprep.subr.mxu1 %v64_v20 }
  0x33   :  { %219 = vmatpush3.msra.mxu0 %v48_v21  ;;  %268 = vmatpush3.msra.mxu1 %v48_v21 }
  0x34   :  { %220 = vmatprep.subr.mxu0 %v63_v22  ;;  %253 = vmatprep.subr.mxu1 %v63_v22 }
  0x35   :  { %221 = vmatpush3.msra.mxu0 %v47_v23  ;;  %269 = vmatpush3.msra.mxu1 %v47_v23 }
  0x36   :  { %222 = vmatprep.subr.mxu0 %v62_v24  ;;  %254 = vmatprep.subr.mxu1 %v62_v24 }
  0x37   :  { %223 = vmatpush3.msra.mxu0 %v46_v25  ;;  %270 = vmatpush3.msra.mxu1 %v46_v25 }
  0x38   :  { %224 = vmatprep.subr.mxu0 %v61_v26  ;;  %255 = vmatprep.subr.mxu1 %v61_v26 }
  0x39   :  { %225 = vmatpush3.msra.mxu0 %v45_v27  ;;  %271 = vmatpush3.msra.mxu1 %v45_v27 }
  0x3a   :  { %226 = vmatprep.subr.mxu0 %v60_v28  ;;  %256 = vmatprep.subr.mxu1 %v60_v28 }
  0x3b   :  { %227 = vmatpush3.msra.mxu0 %v44_v29  ;;  %272 = vmatpush3.msra.mxu1 %v44_v29 }
  0x3c   :  { %228 = vmatprep.subr.mxu0 %v59_v30  ;;  %257 = vmatprep.subr.mxu1 %v59_v30 }
  0x3d   :  { %229 = vmatpush3.msra.mxu0 %v43_v31  ;;  %273 = vmatpush3.msra.mxu1 %v43_v31 }
  0x3e   :  { %154 = vmatprep.mubr.f32.mxu0 %v76_v32  ;;  %164 = vmatprep.mubr.f32.mxu1 %v80_v33 }
  0x3f   :  { %155 = vmatmul.mubr.f32.vlgmr.msra.gmra.mxu0 %v75_v34  ;;  %165 = vmatmul.mubr.f32.vlgmr.msra.gmra.mxu1 %v79_v35 }
  0x40   :  { %159 = vmatprep.mubr.f32.mxu0 %v78_v36  ;;  %169 = vmatprep.mubr.f32.mxu1 %v82_v37 }
  0x43   :  { %160 = vmatmul.mubr.f32.gmra.mxu0 %v77_v38  ;;  %170 = vmatmul.mubr.f32.gmra.mxu1 %v81_v39 }
  0xff   :  { %v230_v40 = vpop.f32.mrf.mxu0  ;;  %v236_v41 = vpop.f32.mrf.mxu1 }
 0x101   :  { %v231_v43 = vpop.f32.mrf.mxu0  ;;  %v237_v44 = vpop.f32.mrf.mxu1 }
 0x102   :  { %v232_v45 = vadd.f32 %v231_v43, %v230_v40  ;;  %v238_v46 = vadd.f32 %v237_v44, %v236_v41 }
 0x103   :  { %v233_v47 = vpop.f32.mrf.mxu0  ;;  %v239_v48 = vpop.f32.mrf.mxu1 }
 0x104   :  { %v157_v49 = vadd.f32 %v232_v45, %v197_v42  ;;  %v167_v50 = vadd.f32 %v238_v46, %v197_v42 }
 0x105   :  { %v234_v51 = vpop.f32.mrf.mxu0  ;;  %v240_v52 = vpop.f32.mrf.mxu1 }
 0x106   :  { %175 = vst [vmem:[#allocation7] sm:$0xff] %v157_v49  ;;  %177 = vst [vmem:[#allocation7 + $0x10] sm:$0xff] %v167_v50  ;;  %v235_v53 = vadd.f32 %v234_v51, %v233_v47  ;;  %v241_v54 = vadd.f32 %v240_v52, %v239_v48 }
 0x108   :  { %v162_v55 = vadd.f32 %v235_v53, %v197_v42  ;;  %v172_v56 = vadd.f32 %v241_v54, %v197_v42 }
 0x10a   :  { %176 = vst [vmem:[#allocation7 + $0x8] sm:$0xff] %v162_v55  ;;  %178 = vst [vmem:[#allocation7 + $0x18] sm:$0xff] %v172_v56 }
 0x10b   :  { %332 = shalt.err (!%p329_p0)
}
 0x10c   :  { %190 = dma.vmem_to_hbm [thread:$0]  %s185_s27, 512, %s395_s3, [#allocation4], %s351_s22, %s351_s22, %s352_s23  }
 0x10d   :  { %345 = dma.done.wait [#allocation4], 512  }
 0x10e   :  { %346 = vsyncadd [#allocation4], 4294966784 }
 0x10f   :  { %194 = vsyncpa [#allocation3], 1 }
 0x110   :  { %195 = vsyncpa [#allocation6], 1 }
 0x111   :  { %196 = vsyncpa [#allocation4], 1 }

</bundles_post_ra>
